<compile_context>
chip_gen: v5e
topology: v5e:2x2
jax: 0.10.0
libtpu: 0.0.40
codegen_flags: <defaults>
</compile_context>

<pallas_src>
import jax
import jax.numpy as jnp
from jax import lax
from jax.experimental import pallas as pl
from jax.experimental.pallas import tpu as pltpu

AGENTS_NUM = 2                       # env.agentNumber (synthetic, deterministic)
D_IN = 6 * AGENTS_NUM                # 12
H1, H2, D_OUT = 16, 8, 1

TB_DEFAULT = 16384                   # batch-tile on the lane axis (multiple of 128)


def _round_up(n, m):
    return ((n + m - 1) // m) * m


def _cdiv(a, b):
    return -(-a // b)


def _choose_tile(B, tb_request):
    """Pick (tile, grid_steps) for the batch axis.

    - B <= one tile: single block whose dims equal the full array dims
      (layout-legal for any B, incl. B=8).
    - B  > one tile: tile is a multiple of 128 (lane dim of the out spec),
      rebalanced so the >=2 grid steps split evenly (v7x megacore).
    """
    tb_request = max(128, _round_up(tb_request, 128))
    if B <= tb_request:
        return B, 1
    steps = _cdiv(B, tb_request)
    tb = _round_up(_cdiv(B, steps), 128)
    steps = _cdiv(B, tb)
    return tb, steps


def critic_kernel(x_ref, w1_ref, b1_ref, w2_ref, b2_ref, w3_ref, b3_ref, o_ref):
    # x tile is in its natural [tb, D_IN] layout; contract the feature axis of
    # BOTH operands so the result is feature-major [H1, tb] (batch on lanes).
    x = x_ref[...]                                                   # [tb, D_IN]
    h1 = jnp.tanh(
        lax.dot_general(
            w1_ref[...], x,
            dimension_numbers=(((1,), (1,)), ((), ())),              # trans-B on MXU
            preferred_element_type=jnp.float32,
        ) + b1_ref[...]
    )                                                                # [H1, tb]
    h2 = jnp.tanh(
        jnp.dot(w2_ref[...], h1, preferred_element_type=jnp.float32) + b2_ref[...]
    )                                                                # [H2, tb]
    # Lane-dense store: [1, tb] row, batch on the 128-lane axis.
    o_ref[...] = (
        jnp.dot(w3_ref[...], h2, preferred_element_type=jnp.float32) + b3_ref[...]
    )                                                                # [1, tb]


def critic_forward(x, params, *, tb=TB_DEFAULT):
    """x: [B, D_IN] float32 -> [B, 1] float32.

    Note: for the B~8 per-env-step production use this call is dominated by
    dispatch overhead; batch several env steps per call when possible.
    """
    w1, b1, w2, b2, w3, b3 = params
    B = x.shape[0]
    tb_eff, steps = _choose_tile(B, tb)

    out_t = pl.pallas_call(
        critic_kernel,
        out_shape=jax.ShapeDtypeStruct((D_OUT, B), jnp.float32),
        grid_spec=pltpu.PrefetchScalarGridSpec(
            num_scalar_prefetch=0,
            grid=(steps,),
            in_specs=[
                pl.BlockSpec((tb_eff, D_IN), lambda i: (i, 0)),      # x tile (natural)
                pl.BlockSpec((H1, D_IN), lambda i: (0, 0)),          # w1 (resident)
                pl.BlockSpec((H1, 1), lambda i: (0, 0)),             # b1
                pl.BlockSpec((H2, H1), lambda i: (0, 0)),            # w2
                pl.BlockSpec((H2, 1), lambda i: (0, 0)),             # b2
                pl.BlockSpec((D_OUT, H2), lambda i: (0, 0)),         # w3
                pl.BlockSpec((D_OUT, 1), lambda i: (0, 0)),          # b3
            ],
            out_specs=pl.BlockSpec((D_OUT, tb_eff), lambda i: (0, i)),  # lane-dense out
        ),
        compiler_params=pltpu.CompilerParams(
            dimension_semantics=("parallel",),        # megacore split on v7x
            vmem_limit_bytes=32 * 1024 * 1024,        # ~17 MiB needed at tb=16384
        ),
    )(x, w1, b1, w2, b2, w3, b3)

    # [1, B] -> [B, 1]: contiguous reshape (free), torch convention.
    return out_t.reshape(B, D_OUT)


def init_params(key):
    """Deterministic init mimicking nn.Linear default (uniform +/- 1/sqrt(fan_in)).

    Weights in torch orientation [out, in]; biases as [out, 1] so they
    broadcast over the lane (batch) axis inside the kernel.
    """
    ks = jax.random.split(key, 6)

    def linear(kw, kb, fan_in, fan_out):
        bound = 1.0 / jnp.sqrt(fan_in)
        w = jax.random.uniform(kw, (fan_out, fan_in), jnp.float32, -bound, bound)
        b = jax.random.uniform(kb, (fan_out, 1), jnp.float32, -bound, bound)
        return w, b

    w1, b1 = linear(ks[0], ks[1], D_IN, H1)
    w2, b2 = linear(ks[2], ks[3], H1, H2)
    w3, b3 = linear(ks[4], ks[5], H2, D_OUT)
    return (w1, b1, w2, b2, w3, b3)


def critic_ref(x, params):
    w1, b1, w2, b2, w3, b3 = params
    h1 = jnp.tanh(x @ w1.T + b1.T)
    h2 = jnp.tanh(h1 @ w2.T + b2.T)
    return h2 @ w3.T + b3.T


if __name__ == "__main__":
    key = jax.random.PRNGKey(0)
    kx, kx2, kp = jax.random.split(key, 3)
    params = init_params(kp)

    # Small case (matches the module's per-step usage): single full block.
    B = 8
    x = jax.random.normal(kx, (B, D_IN), jnp.float32)
    out = jax.block_until_ready(critic_forward(x, params))
    ref = critic_ref(x, params)
    assert out.shape == (B, D_OUT)
    assert jnp.allclose(out, ref, atol=1e-5, rtol=1e-5)

    # Multi-step grid with a partial trailing tile (300 = 2*128 + 44).
    B2 = 300
    x2 = jax.random.normal(kx2, (B2, D_IN), jnp.float32)
    out2 = jax.block_until_ready(critic_forward(x2, params, tb=128))
    ref2 = critic_ref(x2, params)
    assert out2.shape == (B2, D_OUT)
    assert jnp.allclose(out2, ref2, atol=1e-5, rtol=1e-5)

    print("KERNEL_OK")
</pallas_src>

<mosaic_0001>
module attributes {stable_mosaic.version = 11 : i64} {
  func.func @critic_kernel(%arg0: i32, %arg1: memref<8x12xf32, #tpu.memory_space<vmem>>, %arg2: memref<16x12xf32, #tpu.memory_space<vmem>>, %arg3: memref<16x1xf32, #tpu.memory_space<vmem>>, %arg4: memref<8x16xf32, #tpu.memory_space<vmem>>, %arg5: memref<8x1xf32, #tpu.memory_space<vmem>>, %arg6: memref<1x8xf32, #tpu.memory_space<vmem>>, %arg7: memref<1x1xf32, #tpu.memory_space<vmem>>, %arg8: memref<1x8xf32, #tpu.memory_space<vmem>>) attributes {dimension_semantics = [#tpu.dimension_semantics<parallel>], iteration_bounds = array<i64: 1>, scalar_prefetch = 0 : i64, scratch_operands = 0 : i64, tpu.core_type = #tpu.core_type<tc>, window_params = [{transform_indices = @transform_0, window_bounds = array<i64: 8, 12>}, {pipeline_mode = #tpu.pipeline_mode<synchronous>, transform_indices = @transform_1, window_bounds = array<i64: 16, 12>}, {pipeline_mode = #tpu.pipeline_mode<synchronous>, transform_indices = @transform_2, window_bounds = array<i64: 16, 1>}, {pipeline_mode = #tpu.pipeline_mode<synchronous>, transform_indices = @transform_3, window_bounds = array<i64: 8, 16>}, {pipeline_mode = #tpu.pipeline_mode<synchronous>, transform_indices = @transform_4, window_bounds = array<i64: 8, 1>}, {pipeline_mode = #tpu.pipeline_mode<synchronous>, transform_indices = @transform_5, window_bounds = array<i64: 1, 8>}, {pipeline_mode = #tpu.pipeline_mode<synchronous>, transform_indices = @transform_6, window_bounds = array<i64: 1, 1>}, {transform_indices = @transform_7, window_bounds = array<i64: 1, 8>}]} {
    %c0 = arith.constant 0 : index
    %c0_0 = arith.constant 0 : index
    %0 = vector.load %arg1[%c0, %c0_0] : memref<8x12xf32, #tpu.memory_space<vmem>>, vector<8x12xf32>
    %c0_1 = arith.constant 0 : index
    %c0_2 = arith.constant 0 : index
    %1 = vector.load %arg2[%c0_1, %c0_2] : memref<16x12xf32, #tpu.memory_space<vmem>>, vector<16x12xf32>
    %cst = arith.constant dense<0.000000e+00> : vector<16x8xf32>
    %2 = tpu.matmul %1, %0, %cst {dimension_numbers = #tpu.dot_dimension_numbers<[1], [1], [0], [0], [0, 0, 1, 0], [], []>} : vector<16x12xf32>, vector<8x12xf32>, vector<16x8xf32> -> vector<16x8xf32>
    %c0_3 = arith.constant 0 : index
    %c0_4 = arith.constant 0 : index
    %3 = vector.load %arg3[%c0_3, %c0_4] : memref<16x1xf32, #tpu.memory_space<vmem>>, vector<16x1xf32>
    %4 = vector.broadcast %3 : vector<16x1xf32> to vector<16x8xf32>
    %5 = arith.addf %2, %4 : vector<16x8xf32>
    %6 = math.tanh %5 : vector<16x8xf32>
    %c0_5 = arith.constant 0 : index
    %c0_6 = arith.constant 0 : index
    %7 = vector.load %arg4[%c0_5, %c0_6] : memref<8x16xf32, #tpu.memory_space<vmem>>, vector<8x16xf32>
    %cst_7 = arith.constant dense<0.000000e+00> : vector<8x8xf32>
    %8 = tpu.matmul %7, %6, %cst_7 {dimension_numbers = #tpu.dot_dimension_numbers<[1], [0], [0], [1], [0, 0, 1, 1], [], []>} : vector<8x16xf32>, vector<16x8xf32>, vector<8x8xf32> -> vector<8x8xf32>
    %c0_8 = arith.constant 0 : index
    %c0_9 = arith.constant 0 : index
    %9 = vector.load %arg5[%c0_8, %c0_9] : memref<8x1xf32, #tpu.memory_space<vmem>>, vector<8x1xf32>
    %10 = vector.broadcast %9 : vector<8x1xf32> to vector<8x8xf32>
    %11 = arith.addf %8, %10 : vector<8x8xf32>
    %12 = math.tanh %11 : vector<8x8xf32>
    %c0_10 = arith.constant 0 : index
    %c0_11 = arith.constant 0 : index
    %13 = vector.load %arg6[%c0_10, %c0_11] : memref<1x8xf32, #tpu.memory_space<vmem>>, vector<1x8xf32>
    %cst_12 = arith.constant dense<0.000000e+00> : vector<1x8xf32>
    %14 = tpu.matmul %13, %12, %cst_12 {dimension_numbers = #tpu.dot_dimension_numbers<[1], [0], [0], [1], [0, 0, 1, 1], [], []>} : vector<1x8xf32>, vector<8x8xf32>, vector<1x8xf32> -> vector<1x8xf32>
    %c0_13 = arith.constant 0 : index
    %c0_14 = arith.constant 0 : index
    %15 = vector.load %arg7[%c0_13, %c0_14] : memref<1x1xf32, #tpu.memory_space<vmem>>, vector<1x1xf32>
    %16 = vector.broadcast %15 : vector<1x1xf32> to vector<1x8xf32>
    %17 = arith.addf %14, %16 : vector<1x8xf32>
    %c0_15 = arith.constant 0 : index
    %c0_16 = arith.constant 0 : index
    %18 = vector.load %arg8[%c0_15, %c0_16] : memref<1x8xf32, #tpu.memory_space<vmem>>, vector<1x8xf32>
    tpu.vector_store %arg8[%c0_15, %c0_16], %17 {strides = array<i32>} : memref<1x8xf32, #tpu.memory_space<vmem>>, vector<1x8xf32>,
    return
  }
  func.func @transform_0(%arg0: i32) -> (i32, i32) {
    %c0_i32 = arith.constant 0 : i32
    %c0_i32_0 = arith.constant 0 : i32
    return %arg0, %c0_i32 : i32, i32
  }
  func.func @transform_1(%arg0: i32) -> (i32, i32) {
    %c0_i32 = arith.constant 0 : i32
    %c0_i32_0 = arith.constant 0 : i32
    %c0_i32_1 = arith.constant 0 : i32
    return %c0_i32, %c0_i32_0 : i32, i32
  }
  func.func @transform_2(%arg0: i32) -> (i32, i32) {
    %c0_i32 = arith.constant 0 : i32
    %c0_i32_0 = arith.constant 0 : i32
    %c0_i32_1 = arith.constant 0 : i32
    return %c0_i32, %c0_i32_0 : i32, i32
  }
  func.func @transform_3(%arg0: i32) -> (i32, i32) {
    %c0_i32 = arith.constant 0 : i32
    %c0_i32_0 = arith.constant 0 : i32
    %c0_i32_1 = arith.constant 0 : i32
    return %c0_i32, %c0_i32_0 : i32, i32
  }
  func.func @transform_4(%arg0: i32) -> (i32, i32) {
    %c0_i32 = arith.constant 0 : i32
    %c0_i32_0 = arith.constant 0 : i32
    %c0_i32_1 = arith.constant 0 : i32
    return %c0_i32, %c0_i32_0 : i32, i32
  }
  func.func @transform_5(%arg0: i32) -> (i32, i32) {
    %c0_i32 = arith.constant 0 : i32
    %c0_i32_0 = arith.constant 0 : i32
    %c0_i32_1 = arith.constant 0 : i32
    return %c0_i32, %c0_i32_0 : i32, i32
  }
  func.func @transform_6(%arg0: i32) -> (i32, i32) {
    %c0_i32 = arith.constant 0 : i32
    %c0_i32_0 = arith.constant 0 : i32
    %c0_i32_1 = arith.constant 0 : i32
    return %c0_i32, %c0_i32_0 : i32, i32
  }
  func.func @transform_7(%arg0: i32) -> (i32, i32) {
    %c0_i32 = arith.constant 0 : i32
    %c0_i32_0 = arith.constant 0 : i32
    return %c0_i32, %arg0 : i32, i32
  }
}

</mosaic_0001>

<bundles_post_ra>
// kernel: tpu_custom_call.1
= control target key start
LH: loop header
LB: loop body
LE: loop exit
PB: predicated region body
PF: predicated region fallthrough
CT: control target
= control target key end

     0   :  { %s318_s0 = inlined_call_operand.vmem [shape: f32[8,12], index: 0, kind: input, shape index: {}]   ;;  %s319_s1 = inlined_call_operand.vmem [shape: f32[16,12], index: 1, kind: input, shape index: {}]   ;;  %s320_s2 = inlined_call_operand.vmem [shape: f32[16,1], index: 2, kind: input, shape index: {}]   ;;  %s321_s3 = inlined_call_operand.hbm [shape: f32[8,16], index: 3, kind: input, shape index: {}]   ;;  %s322_s4 = inlined_call_operand.vmem [shape: f32[8,1], index: 4, kind: input, shape index: {}]   ;;  %s323_s5 = inlined_call_operand.vmem [shape: f32[1,8], index: 5, kind: input, shape index: {}]   ;;  %s324_s6 = inlined_call_operand.<no memory space> [shape: f32[1,1], index: 6, kind: input, shape index: {}]   ;;  %s325_s7 = inlined_call_operand.hbm [shape: f32[1,8], index: 7, kind: output, shape index: {}]  }
   0x1   :  { %v12_v0 = vstv %s324_s6 }
   0x2   :  { %13 = vst [vmem:[#allocation2] sm:$0x1] %v12_v0 }
   0x3   :  { %14 = vsyncpa [#allocation4], 0 }
   0x4   :  { %15 = vsyncpa [#allocation5], 0  ;;  %s27_s28 = sshll.u32 %s321_s3, 4  ;;  %s245_s29 = smov [#allocation3]   ;;  %s28_s28 = int_to_ptr.hbm [resolvable:$true] %s27_s28 }
   0x5   :  { %s29_s30 = sshll.u32 %s245_s29, 4  ;;  %s30_s30 = int_to_ptr.vmem [resolvable:$true] %s29_s30 }
   0x6   :  { %32 = dma.hbm_to_vmem [thread:$0]  %s28_s28, 128, %s30_s30, [#allocation4]  }
   0x7   :  { %241 = dma.done.wait [#allocation4], 128  }
   0x8   :  { %242 = vsyncadd [#allocation4], 4294967168  ;;  %v246_v1 = vmov 0   ;;  %vm58_vm0 = vcmask 97280   ;;  %v43_v2 = vld [vmem:[%s318_s0] sm:$0xff]  ;;  %v45_v4 = vld [vmem:[%s319_s1 + $0x8] sm:$0xff] }
   0x9   :  { %185 = vset.pattern.permute.xlu0 %v246_v1  ;;  %186 = vset.pattern.permute.xlu1 %v246_v1  ;;  %v44_v3 = vld [vmem:[%s319_s1] sm:$0xff]  ;;  %v47_v5 = vld [vmem:[%s320_s2 + $0x8] sm:$0xff]  ;;  %vm100_vm1 = vcmask 130048   ;;  %vm133_vm2 = vcmask 64512   ;;  %s166_s20 = sshll.u32 %s325_s7, 4  ;;  %vm157_vm3 = vcmask 57344   ;;  %s167_s20 = int_to_ptr.hbm [resolvable:$true] %s166_s20 }
   0xa   :  { %176 = vmatpush.xpose.msk.msra.mxu0 %vm58_vm0, %v43_v2  ;;  %181 = vmatpush.xpose.msk.msra.mxu3 %vm58_vm0, %v43_v2  ;;  %v46_v6 = vld [vmem:[%s320_s2] sm:$0xff] }
   0xb   :  { %55 = vperm.xlu0 %185, %v47_v5   ;;  %v94_v7 = vld [vmem:[%s322_s4] sm:$0xff]  ;;  %s247_s4 = smov [#allocation6]  }
   0xc   :  { %97 = vperm.xlu1 %186, %v94_v7   ;;  %v126_v8 = vld [vmem:[#allocation2] sm:$0x1]  ;;  %v93_v16 = vld [vmem:[#allocation3] sm:$0xff]  ;;  %s164_s17 = sshll.u32 %s247_s4, 4  ;;  %s165_s17 = int_to_ptr.vmem [resolvable:$true] %s164_s17 }
   0xd   :  { %177 = vmatmul.msk.f32.vlgmr.msra.gmra.mxu0 %vm58_vm0, %v44_v3  ;;  %178 = vmatmul.msk.f32.vlgmr.msra.gmra.mxu3 %vm58_vm0, %v45_v4  ;;  %v125_v21 = vld [vmem:[%s323_s5] sm:$0x1] }
  0x13   :  { %50 = vperm.xlu0 %185, %v46_v6  }
  0x14   :  { %129 = vperm.xlu1 %186, %v126_v8  }
  0x7d   :  { %v56_v9 = vpop.permute.xlu0 %55 }
  0x7e   :  { %v98_v18 = vpop.permute.xlu1 %97 }
  0x85   :  { %v51_v10 = vpop.permute.xlu0 %50 }
  0x86   :  { %v130_v23 = vpop.permute.xlu1 %129 }
  0x87   :  { %v132_v24 = vperm.slane %v130_v23, 0 }
  0x8a   :  { %v85_v11 = vpop.f32.mrf.mxu0 }
  0x8b   :  { %v86_v13 = vadd.f32 %v85_v11, %v51_v10 }
  0x90   :  { %v88_v12 = vpop.f32.mrf.mxu3 }
  0x91   :  { %v89_v14 = vadd.f32 %v88_v12, %v56_v9 }
  0x93   :  { %187 = vtanh.f32 %v89_v14 }
  0x94   :  { %189 = vtanh.f32 %v86_v13 }
  0x99   :  { %v188_v15 = vpop.eup %187 }
  0x9a   :  { %118 = vmatpush.msra.mxu1 %v188_v15  ;;  %v190_v17 = vpop.eup %189 }
  0x9c   :  { %119 = vmatpush.msra.mxu1 %v190_v17 }
  0x9d   :  { %179 = vmatmul.msk.f32.vlgmr.msra.gmra.mxu1 %vm100_vm1, %v93_v16 }
 0x11a   :  { %v121_v19 = vpop.f32.mrf.mxu1 }
 0x11b   :  { %v122_v20 = vadd.f32 %v121_v19, %v98_v18 }
 0x11d   :  { %191 = vtanh.f32 %v122_v20 }
 0x123   :  { %v192_v22 = vpop.eup %191 }
 0x124   :  { %152 = vmatpush.msra.mxu2 %v192_v22 }
 0x125   :  { %180 = vmatmul.msk.f32.vlgmr.msra.gmra.mxu2 %vm133_vm2, %v125_v21 }
 0x1a8   :  { %v154_v25 = vpop.f32.mrf.mxu2 }
 0x1a9   :  { %v155_v26 = vadd.f32 %v154_v25, %v132_v24 }
 0x1ab   :  { %158 = vst.msk [vmem:[#allocation6] sm:$0x1] %vm157_vm3, %v155_v26 }
 0x1ac   :  { %169 = dma.vmem_to_hbm [thread:$0]  %s165_s17, 16, %s167_s20, [#allocation5]  }
 0x1ad   :  { %243 = dma.done.wait [#allocation5], 16  }
 0x1ae   :  { %244 = vsyncadd [#allocation5], 4294967280 }
 0x1af   :  { %174 = vsyncpa [#allocation4], 1 }
 0x1b0   :  { %175 = vsyncpa [#allocation5], 1 }

</bundles_post_ra>
